<compile_context>
chip_gen: v7x
topology: tpu7x:2x2x1
jax: 0.10.0
libtpu: 0.0.40
codegen_flags: <defaults>
</compile_context>

<pallas_src>
import math as m

import jax
import jax.numpy as jnp
from jax import lax
from jax.experimental import pallas as pl
from jax.experimental.pallas import tpu as pltpu


def _embedding_kernel(idx_ref, t_hi_ref, t_mid_ref, t_lo_ref, out_ref):
    # idx_ref:              (T, 1) int32   index tile (VMEM)
    # t_hi/t_mid/t_lo_ref:  (L, E) bf16    table planes (resident across grid)
    # out_ref:              (T, E) f32     gathered embeddings
    idx = idx_ref[...]                                        # (T, 1)
    L = t_hi_ref.shape[0]
    levels = lax.broadcasted_iota(jnp.int32, (1, L), 1)       # (1, L), 2 vregs
    onehot = (levels == idx).astype(jnp.bfloat16)             # (T, L) bf16 one-hot

    # Three full-rate bf16 MXU matmuls, f32 accumulation.  Because each row of
    # `onehot` has exactly one 1.0, each dot selects the corresponding plane row
    # exactly; (hi + mid) + lo reconstructs the original f32 table bit-exactly.
    hi = jnp.dot(onehot, t_hi_ref[...], preferred_element_type=jnp.float32)
    mid = jnp.dot(onehot, t_mid_ref[...], preferred_element_type=jnp.float32)
    lo = jnp.dot(onehot, t_lo_ref[...], preferred_element_type=jnp.float32)
    out_ref[...] = (hi + mid) + lo


def _split_f32_to_bf16_planes(table_f32):
    """Split an f32 array into three bf16 planes summing exactly back to f32."""
    t_hi = table_f32.astype(jnp.bfloat16)
    r1 = table_f32 - t_hi.astype(jnp.float32)
    t_mid = r1.astype(jnp.bfloat16)
    t_lo = (r1 - t_mid.astype(jnp.float32)).astype(jnp.bfloat16)
    return t_hi, t_mid, t_lo


def pcm_embedding_forward(x, table, *, tile=2048):
    """x: int32 (B, S) indices in [0, num_levels). table: f32 (num_levels, embed_dim)."""
    B, S = x.shape
    L, E = table.shape
    N = B * S

    # Adaptive tile: multiple of 256 (MXU-friendly on every generation), never
    # larger than the padded problem itself.
    tile = max(256, min(tile, ((N + 255) // 256) * 256))
    n_tiles = pl.cdiv(N, tile)
    N_pad = n_tiles * tile

    # Flatten and pad indices (pad rows gather level 0; sliced off below).
    x_flat = x.reshape(N).astype(jnp.int32)
    if N_pad != N:
        x_flat = jnp.pad(x_flat, (0, N_pad - N))
    x_flat = x_flat.reshape(N_pad, 1)

    t_hi, t_mid, t_lo = _split_f32_to_bf16_planes(table.astype(jnp.float32))

    out_flat = pl.pallas_call(
        _embedding_kernel,
        out_shape=jax.ShapeDtypeStruct((N_pad, E), jnp.float32),
        grid_spec=pltpu.PrefetchScalarGridSpec(
            num_scalar_prefetch=0,
            grid=(n_tiles,),
            in_specs=[
                pl.BlockSpec((tile, 1), lambda i: (i, 0)),   # index tile
                pl.BlockSpec((L, E), lambda i: (0, 0)),      # hi plane, resident
                pl.BlockSpec((L, E), lambda i: (0, 0)),      # mid plane, resident
                pl.BlockSpec((L, E), lambda i: (0, 0)),      # lo plane, resident
            ],
            out_specs=pl.BlockSpec((tile, E), lambda i: (i, 0)),
        ),
        compiler_params=pltpu.CompilerParams(
            dimension_semantics=("parallel",)),   # independent tiles -> megacore/v7x
    )(x_flat, t_hi, t_mid, t_lo)

    return out_flat[:N].reshape(B, S, E)


def make_pcm_embedding_table(key, embed_dim=128, num_levels=256):
    """Deterministic reproduction of PCMEmbedding.__init__ weight init."""
    a = m.sqrt(12.0) * (jax.random.uniform(key, (num_levels, embed_dim),
                                           dtype=jnp.float32) - 0.5)
    row_offset = m.sqrt(12.0) * (jnp.arange(num_levels, dtype=jnp.float32)
                                 - num_levels / 2.0)
    a = a + row_offset[:, None]
    return 0.1 * a


if __name__ == "__main__":
    embed_dim = 128
    num_levels = 256

    key = jax.random.PRNGKey(0)
    k_w, k_x1, k_x2 = jax.random.split(key, 3)

    table = make_pcm_embedding_table(k_w, embed_dim=embed_dim,
                                     num_levels=num_levels)

    # Small module-sized test (adaptive tile shrinks to 256).
    B, S = 2, 8
    x = jax.random.randint(k_x1, (B, S), 0, num_levels, dtype=jnp.int32)
    out = jax.block_until_ready(pcm_embedding_forward(x, table))
    ref = table[x]
    assert out.shape == (B, S, embed_dim)
    assert out.dtype == jnp.float32
    assert bool(jnp.allclose(out, ref, atol=1e-6, rtol=1e-6))

    # Multi-tile + padding test (N = 4800 -> 3 tiles of 2048 with a padded tail).
    B2, S2 = 4, 1200
    x2 = jax.random.randint(k_x2, (B2, S2), 0, num_levels, dtype=jnp.int32)
    out2 = jax.block_until_ready(pcm_embedding_forward(x2, table, tile=2048))
    ref2 = table[x2]
    assert out2.shape == (B2, S2, embed_dim)
    assert bool(jnp.allclose(out2, ref2, atol=1e-6, rtol=1e-6))

    print("KERNEL_OK")
</pallas_src>

<mosaic_0001>
module attributes {stable_mosaic.version = 11 : i64} {
  func.func @_embedding_kernel(%arg0: i32, %arg1: memref<256x1xi32, #tpu.memory_space<vmem>>, %arg2: memref<256x128xbf16, #tpu.memory_space<vmem>>, %arg3: memref<256x128xbf16, #tpu.memory_space<vmem>>, %arg4: memref<256x128xbf16, #tpu.memory_space<vmem>>, %arg5: memref<256x128xf32, #tpu.memory_space<vmem>>) attributes {dimension_semantics = [#tpu.dimension_semantics<parallel>], iteration_bounds = array<i64: 1>, scalar_prefetch = 0 : i64, scratch_operands = 0 : i64, tpu.core_type = #tpu.core_type<tc>, window_params = [{transform_indices = @transform_0, window_bounds = array<i64: 256, 1>}, {pipeline_mode = #tpu.pipeline_mode<synchronous>, transform_indices = @transform_1, window_bounds = array<i64: 256, 128>}, {pipeline_mode = #tpu.pipeline_mode<synchronous>, transform_indices = @transform_2, window_bounds = array<i64: 256, 128>}, {pipeline_mode = #tpu.pipeline_mode<synchronous>, transform_indices = @transform_3, window_bounds = array<i64: 256, 128>}, {transform_indices = @transform_4, window_bounds = array<i64: 256, 128>}]} {
    %c0 = arith.constant 0 : index
    %c0_0 = arith.constant 0 : index
    %0 = vector.load %arg1[%c0, %c0_0] : memref<256x1xi32, #tpu.memory_space<vmem>>, vector<256x1xi32>
    %1 = tpu.iota {dimensions = array<i32: 1>} : vector<1x256xi32>
    %2 = vector.broadcast %1 : vector<1x256xi32> to vector<256x256xi32>
    %3 = vector.broadcast %0 : vector<256x1xi32> to vector<256x256xi32>
    %4 = arith.cmpi eq, %2, %3 : vector<256x256xi32>
    %5 = arith.extui %4 : vector<256x256xi1> to vector<256x256xi32>
    %6 = arith.sitofp %5 : vector<256x256xi32> to vector<256x256xf32>
    %7 = arith.truncf %6 : vector<256x256xf32> to vector<256x256xbf16>
    %c0_1 = arith.constant 0 : index
    %c0_2 = arith.constant 0 : index
    %8 = vector.load %arg2[%c0_1, %c0_2] : memref<256x128xbf16, #tpu.memory_space<vmem>>, vector<256x128xbf16>
    %cst = arith.constant dense<0.000000e+00> : vector<256x128xf32>
    %9 = tpu.matmul %7, %8, %cst {dimension_numbers = #tpu.dot_dimension_numbers<[1], [0], [0], [1], [0, 0, 1, 1], [], []>} : vector<256x256xbf16>, vector<256x128xbf16>, vector<256x128xf32> -> vector<256x128xf32>
    %c0_3 = arith.constant 0 : index
    %c0_4 = arith.constant 0 : index
    %10 = vector.load %arg3[%c0_3, %c0_4] : memref<256x128xbf16, #tpu.memory_space<vmem>>, vector<256x128xbf16>
    %cst_5 = arith.constant dense<0.000000e+00> : vector<256x128xf32>
    %11 = tpu.matmul %7, %10, %cst_5 {dimension_numbers = #tpu.dot_dimension_numbers<[1], [0], [0], [1], [0, 0, 1, 1], [], []>} : vector<256x256xbf16>, vector<256x128xbf16>, vector<256x128xf32> -> vector<256x128xf32>
    %c0_6 = arith.constant 0 : index
    %c0_7 = arith.constant 0 : index
    %12 = vector.load %arg4[%c0_6, %c0_7] : memref<256x128xbf16, #tpu.memory_space<vmem>>, vector<256x128xbf16>
    %cst_8 = arith.constant dense<0.000000e+00> : vector<256x128xf32>
    %13 = tpu.matmul %7, %12, %cst_8 {dimension_numbers = #tpu.dot_dimension_numbers<[1], [0], [0], [1], [0, 0, 1, 1], [], []>} : vector<256x256xbf16>, vector<256x128xbf16>, vector<256x128xf32> -> vector<256x128xf32>
    %14 = arith.addf %9, %11 : vector<256x128xf32>
    %15 = arith.addf %14, %13 : vector<256x128xf32>
    %c0_9 = arith.constant 0 : index
    %c0_10 = arith.constant 0 : index
    %16 = vector.load %arg5[%c0_9, %c0_10] : memref<256x128xf32, #tpu.memory_space<vmem>>, vector<256x128xf32>
    tpu.vector_store %arg5[%c0_9, %c0_10], %15 {strides = array<i32>} : memref<256x128xf32, #tpu.memory_space<vmem>>, vector<256x128xf32>,
    return
  }
  func.func @transform_0(%arg0: i32) -> (i32, i32) {
    %c0_i32 = arith.constant 0 : i32
    %c0_i32_0 = arith.constant 0 : i32
    return %arg0, %c0_i32 : i32, i32
  }
  func.func @transform_1(%arg0: i32) -> (i32, i32) {
    %c0_i32 = arith.constant 0 : i32
    %c0_i32_0 = arith.constant 0 : i32
    %c0_i32_1 = arith.constant 0 : i32
    return %c0_i32, %c0_i32_0 : i32, i32
  }
  func.func @transform_2(%arg0: i32) -> (i32, i32) {
    %c0_i32 = arith.constant 0 : i32
    %c0_i32_0 = arith.constant 0 : i32
    %c0_i32_1 = arith.constant 0 : i32
    return %c0_i32, %c0_i32_0 : i32, i32
  }
  func.func @transform_3(%arg0: i32) -> (i32, i32) {
    %c0_i32 = arith.constant 0 : i32
    %c0_i32_0 = arith.constant 0 : i32
    %c0_i32_1 = arith.constant 0 : i32
    return %c0_i32, %c0_i32_0 : i32, i32
  }
  func.func @transform_4(%arg0: i32) -> (i32, i32) {
    %c0_i32 = arith.constant 0 : i32
    %c0_i32_0 = arith.constant 0 : i32
    return %arg0, %c0_i32 : i32, i32
  }
}

</mosaic_0001>

<bundles_post_ra>
// kernel: tpu_custom_call.1
= control target key start
LH: loop header
LB: loop body
LE: loop exit
PB: predicated region body
PF: predicated region fallthrough
CT: control target
= control target key end

     0   :  { %9 = vsyncpa [#allocation3], 0  ;;  %s2928_s0 = inlined_call_operand.vmem [shape: s32[256,1], index: 0, kind: input, shape index: {}]   ;;  %s2929_s1 = inlined_call_operand.vmem [shape: bf16[256,128], index: 1, kind: input, shape index: {}]   ;;  %s2930_s2 = inlined_call_operand.vmem [shape: bf16[256,128], index: 2, kind: input, shape index: {}]   ;;  %s2931_s3 = inlined_call_operand.hbm [shape: bf16[256,128], index: 3, kind: input, shape index: {}]   ;;  %s2932_s4 = inlined_call_operand.hbm [shape: f32[256,128], index: 4, kind: output, shape index: {}]  }
   0x1   :  { %10 = vsyncpa [#allocation4], 0  ;;  %s2098_s15 = smov [#allocation2]   ;;  %s2050_s19 = scalar_lea.hbm %s2931_s3, 2048 }
   0x2   :  { %s22_s16 = sshll.u32 %s2098_s15, 4  ;;  %p2051_p0 = scmp.ne.s32.totalorder %s2931_s3, %s2050_s19  ;;  %s23_s16 = int_to_ptr.vmem [resolvable:$true] %s22_s16 }
   0x3   :  { %p2054_p1 = scmp.lt.u32.totalorder %s2050_s19, %s2931_s3 }
   0x5   :  { %p2056_p2 = pnand %p2054_p1, %p2051_p0 }
   0x7   :  { %2059 = shalt.err (!%p2056_p2)
}
   0x8   :  { %s2060_s24 = scalar_lea.vmem %s23_s16, 2048  ;;  %p2065_p4 = scmp.lt.s32.totalorder %s23_s16, %s23_s16 }
   0x9   :  { %p2061_p3 = scmp.ne.s32.totalorder %s23_s16, %s2060_s24  ;;  %p2066_p5 = scmp.lt.s32.totalorder %s2060_s24, %s2060_s24 }
   0xb   :  { %p2067_p6 = por %p2066_p5, %p2065_p4 }
   0xd   :  { %p2068_p7 = pnand %p2067_p6, %p2061_p3 }
   0xf   :  { %2071 = shalt.err (!%p2068_p7)
}
  0x10   :  { %s2099_s25 = smov 64   ;;  %s2100_s26 = smov 4  }
  0x11   :  { %28 = dma.hbm_to_vmem [thread:$0]  %s2931_s3, 2048, %s23_s16, [#allocation3], %s2099_s25, %s2099_s25, %s2100_s26  }
  0x12   :  { %2094 = dma.done.wait [#allocation3], 2048  }
  0x13   :  { %2095 = vsyncadd [#allocation3], 4294965248  ;;  %v2101_v0 = vmov 0   ;;  %v49_v1 = vld [vmem:[%s2928_s0 + $0x80] sm:$0xff]  ;;  %v50_v3 = vld [vmem:[%s2928_s0 + $0x88] sm:$0xff]  ;;  %v65_v51 = vlaneseq  ;;  %v2977_v58 = vmov 0 }
  0x14   :  { %2001 = vset.pattern.permute.xlu1 %v2101_v0  ;;  %2000 = vset.pattern.permute.xlu0 %v2101_v0  ;;  %v33_v2 = vld [vmem:[%s2928_s0] sm:$0xff]  ;;  %v34_v4 = vld [vmem:[%s2928_s0 + $0x8] sm:$0xff]  ;;  %v36_v5 = vld [vmem:[%s2928_s0 + $0x18] sm:$0xff] }
  0x15   :  { %117 = vperm.xlu1 %2001, %v49_v1   ;;  %69 = vperm.xlu0 %2000, %v33_v2   ;;  %v35_v6 = vld [vmem:[%s2928_s0 + $0x10] sm:$0xff]  ;;  %v52_v7 = vld [vmem:[%s2928_s0 + $0x98] sm:$0xff]  ;;  %v2002_v9 = vld [vmem:[%s2930_s2 + $0x40] sm:$0xff]   ;;  %v2290_v52 = vand.u32 127, %v65_v51  ;;  %v2102_v1 = vmov 1.0|1.0  }
  0x16   :  { %v51_v8 = vld [vmem:[%s2928_s0 + $0x90] sm:$0xff]  ;;  %v38_v10 = vld [vmem:[%s2928_s0 + $0x28] sm:$0xff]  ;;  %v2003_v11 = vld [vmem:[%s2930_s2] sm:$0xff]   ;;  %1640 = vmatprep.subr.bf16.mxu0 %v2002_v9  ;;  %1976 = vmatprep.subr.bf16.mxu1 %v2002_v9  ;;  %v2983_v2 = vmov 0 }
  0x17   :  { %v2004_v12 = vld [vmem:[%s2930_s2 + $0x48] sm:$0xff]   ;;  %v37_v13 = vld [vmem:[%s2928_s0 + $0x20] sm:$0xff]  ;;  %1641 = vmatpush3.bf16.msra.mxu0 %v2003_v11  ;;  %1984 = vmatpush3.bf16.msra.mxu1 %v2003_v11  ;;  %v2006_v15 = vld [vmem:[%s2930_s2 + $0x50] sm:$0xff]   ;;  %v2293_v55 = vadd.s32 128, %v2290_v52 }
  0x18   :  { %v2005_v14 = vld [vmem:[%s2930_s2 + $0x8] sm:$0xff]   ;;  %1642 = vmatprep.subr.bf16.mxu0 %v2004_v12  ;;  %1977 = vmatprep.subr.bf16.mxu1 %v2004_v12  ;;  %v53_v17 = vld [vmem:[%s2928_s0 + $0xa0] sm:$0xff]  ;;  %v2007_v18 = vld [vmem:[%s2930_s2 + $0x10] sm:$0xff]   ;;  %v2987_v12 = vmov 0 }
  0x19   :  { %120 = vperm.xlu1 %2001, %v50_v3   ;;  %72 = vperm.xlu0 %2000, %v34_v4   ;;  %v54_v16 = vld [vmem:[%s2928_s0 + $0xa8] sm:$0xff]  ;;  %v2008_v19 = vld [vmem:[%s2930_s2 + $0x58] sm:$0xff]   ;;  %v39_v21 = vld [vmem:[%s2928_s0 + $0x30] sm:$0xff] }
  0x1a   :  { %v40_v20 = vld [vmem:[%s2928_s0 + $0x38] sm:$0xff]  ;;  %v2010_v23 = vld [vmem:[%s2930_s2 + $0x60] sm:$0xff]   ;;  %v55_v25 = vld [vmem:[%s2928_s0 + $0xb0] sm:$0xff] }
  0x1b   :  { %1643 = vmatpush3.bf16.msra.mxu0 %v2005_v14  ;;  %1985 = vmatpush3.bf16.msra.mxu1 %v2005_v14  ;;  %v2009_v22 = vld [vmem:[%s2930_s2 + $0x18] sm:$0xff]   ;;  %v2011_v26 = vld [vmem:[%s2930_s2 + $0x20] sm:$0xff]   ;;  %v2012_v27 = vld [vmem:[%s2930_s2 + $0x68] sm:$0xff]  }
  0x1c   :  { %1644 = vmatprep.subr.bf16.mxu0 %v2006_v15  ;;  %1978 = vmatprep.subr.bf16.mxu1 %v2006_v15  ;;  %v56_v24 = vld [vmem:[%s2928_s0 + $0xb8] sm:$0xff]  ;;  %v42_v28 = vld [vmem:[%s2928_s0 + $0x48] sm:$0xff]  ;;  %v41_v29 = vld [vmem:[%s2928_s0 + $0x40] sm:$0xff] }
  0x1d   :  { %78 = vperm.xlu1 %2001, %v36_v5   ;;  %75 = vperm.xlu0 %2000, %v35_v6   ;;  %v2013_v30 = vld [vmem:[%s2930_s2 + $0x28] sm:$0xff]   ;;  %v2014_v31 = vld [vmem:[%s2930_s2 + $0x70] sm:$0xff]   ;;  %v57_v33 = vld [vmem:[%s2928_s0 + $0xc0] sm:$0xff] }
  0x1e   :  { %v58_v32 = vld [vmem:[%s2928_s0 + $0xc8] sm:$0xff]  ;;  %v2015_v34 = vld [vmem:[%s2930_s2 + $0x30] sm:$0xff]   ;;  %v44_v35 = vld [vmem:[%s2928_s0 + $0x58] sm:$0xff] }
  0x1f   :  { %1645 = vmatpush3.bf16.msra.mxu0 %v2007_v18  ;;  %1986 = vmatpush3.bf16.msra.mxu1 %v2007_v18  ;;  %v2016_v36 = vld [vmem:[%s2930_s2 + $0x78] sm:$0xff]   ;;  %v43_v37 = vld [vmem:[%s2928_s0 + $0x50] sm:$0xff]  ;;  %v2018_v39 = vld [vmem:[%s2929_s1 + $0x40] sm:$0xff]  }
  0x20   :  { %1646 = vmatprep.subr.bf16.mxu0 %v2008_v19  ;;  %1979 = vmatprep.subr.bf16.mxu1 %v2008_v19  ;;  %v2017_v38 = vld [vmem:[%s2930_s2 + $0x38] sm:$0xff]   ;;  %v2020_v40 = vld [vmem:[#allocation2 + $0x40] sm:$0xff]   ;;  %v59_v42 = vld [vmem:[%s2928_s0 + $0xd0] sm:$0xff] }
  0x21   :  { %126 = vperm.xlu1 %2001, %v52_v7   ;;  %123 = vperm.xlu0 %2000, %v51_v8   ;;  %v60_v41 = vld [vmem:[%s2928_s0 + $0xd8] sm:$0xff]  ;;  %v46_v43 = vld [vmem:[%s2928_s0 + $0x68] sm:$0xff]  ;;  %v45_v44 = vld [vmem:[%s2928_s0 + $0x60] sm:$0xff] }
  0x22   :  { %v62_v45 = vld [vmem:[%s2928_s0 + $0xe8] sm:$0xff]  ;;  %v61_v46 = vld [vmem:[%s2928_s0 + $0xe0] sm:$0xff]  ;;  %v48_v47 = vld [vmem:[%s2928_s0 + $0x78] sm:$0xff] }
  0x23   :  { %1647 = vmatpush3.bf16.msra.mxu0 %v2009_v22  ;;  %1987 = vmatpush3.bf16.msra.mxu1 %v2009_v22  ;;  %v47_v48 = vld [vmem:[%s2928_s0 + $0x70] sm:$0xff]  ;;  %v64_v49 = vld [vmem:[%s2928_s0 + $0xf8] sm:$0xff]  ;;  %v2019_v60 = vld [vmem:[%s2929_s1] sm:$0xff]  }
  0x24   :  { %1648 = vmatprep.subr.bf16.mxu0 %v2010_v23  ;;  %1980 = vmatprep.subr.bf16.mxu1 %v2010_v23  ;;  %v63_v50 = vld [vmem:[%s2928_s0 + $0xf0] sm:$0xff]  ;;  %v2021_v0 = vld [vmem:[#allocation2] sm:$0xff]   ;;  %v2022_v3 = vld [vmem:[%s2929_s1 + $0x48] sm:$0xff]  }
  0x25   :  { %84 = vperm.xlu1 %2001, %v38_v10   ;;  %81 = vperm.xlu0 %2000, %v37_v13   ;;  %v2024_v5 = vld [vmem:[#allocation2 + $0x48] sm:$0xff]   ;;  %v2026_v10 = vld [vmem:[%s2929_s1 + $0x50] sm:$0xff]   ;;  %v2989_v13 = vmov 0  ;;  %v2030_v19 = vld [vmem:[%s2929_s1 + $0x58] sm:$0xff]  }
  0x26   :  { %v2023_v6 = vld [vmem:[%s2929_s1 + $0x8] sm:$0xff]   ;;  %v2028_v11 = vld [vmem:[#allocation2 + $0x50] sm:$0xff]   ;;  %v2046_v51 = vld [vmem:[%s2929_s1 + $0x78] sm:$0xff]  }
  0x27   :  { %1649 = vmatpush3.bf16.msra.mxu0 %v2011_v26  ;;  %1988 = vmatpush3.bf16.msra.mxu1 %v2011_v26  ;;  %v2025_v9 = vld [vmem:[#allocation2 + $0x8] sm:$0xff]   ;;  %v2034_v26 = vld [vmem:[%s2929_s1 + $0x60] sm:$0xff]  }
  0x28   :  { %1650 = vmatprep.subr.bf16.mxu0 %v2012_v27  ;;  %1981 = vmatprep.subr.bf16.mxu1 %v2012_v27  ;;  %v2995_v27 = vmov 0 }
  0x29   :  { %132 = vperm.xlu1 %2001, %v54_v16   ;;  %129 = vperm.xlu0 %2000, %v53_v17   ;;  %v2027_v16 = vld [vmem:[%s2929_s1 + $0x10] sm:$0xff]  }
  0x2a   :  { %v2029_v17 = vld [vmem:[#allocation2 + $0x10] sm:$0xff]  }
  0x2b   :  { %1651 = vmatpush3.bf16.msra.mxu0 %v2013_v30  ;;  %1989 = vmatpush3.bf16.msra.mxu1 %v2013_v30 }
  0x2c   :  { %1652 = vmatprep.subr.bf16.mxu0 %v2014_v31  ;;  %1982 = vmatprep.subr.bf16.mxu1 %v2014_v31 }
  0x2d   :  { %90 = vperm.xlu1 %2001, %v40_v20   ;;  %87 = vperm.xlu0 %2000, %v39_v21   ;;  %v2032_v21 = vld [vmem:[#allocation2 + $0x58] sm:$0xff]  }
  0x2f   :  { %1653 = vmatpush3.bf16.msra.mxu0 %v2015_v34  ;;  %1990 = vmatpush3.bf16.msra.mxu1 %v2015_v34 }
  0x30   :  { %1654 = vmatprep.subr.bf16.mxu0 %v2016_v36  ;;  %1983 = vmatprep.subr.bf16.mxu1 %v2016_v36  ;;  %v3001_v36 = vmov 0 }
  0x31   :  { %138 = vperm.xlu1 %2001, %v56_v24   ;;  %135 = vperm.xlu0 %2000, %v55_v25   ;;  %v2031_v24 = vld [vmem:[%s2929_s1 + $0x18] sm:$0xff]  }
  0x32   :  { %v2033_v25 = vld [vmem:[#allocation2 + $0x18] sm:$0xff]  }
  0x33   :  { %1655 = vmatpush3.bf16.msra.mxu0 %v2017_v38  ;;  %1991 = vmatpush3.bf16.msra.mxu1 %v2017_v38 }
  0x34   :  { %1864 = vmatprep.subr.bf16.mxu0 %v2018_v39  ;;  %1752 = vmatprep.subr.bf16.mxu1 %v2020_v40  ;;  %v2039_v40 = vld [vmem:[%s2929_s1 + $0x28] sm:$0xff]  }
  0x35   :  { %96 = vperm.xlu1 %2001, %v42_v28   ;;  %93 = vperm.xlu0 %2000, %v41_v29   ;;  %v2036_v28 = vld [vmem:[#allocation2 + $0x60] sm:$0xff]   ;;  %v2997_v29 = vmov 0 }
  0x39   :  { %144 = vperm.xlu1 %2001, %v58_v32   ;;  %141 = vperm.xlu0 %2000, %v57_v33   ;;  %v2035_v32 = vld [vmem:[%s2929_s1 + $0x20] sm:$0xff]  }
  0x3a   :  { %v2037_v33 = vld [vmem:[#allocation2 + $0x20] sm:$0xff]  }
  0x3d   :  { %102 = vperm.xlu1 %2001, %v44_v35   ;;  %99 = vperm.xlu0 %2000, %v43_v37   ;;  %v2038_v35 = vld [vmem:[%s2929_s1 + $0x68] sm:$0xff]  }
  0x3e   :  { %v2040_v37 = vld [vmem:[#allocation2 + $0x68] sm:$0xff]  }
  0x41   :  { %150 = vperm.xlu1 %2001, %v60_v41   ;;  %147 = vperm.xlu0 %2000, %v59_v42   ;;  %v2041_v41 = vld [vmem:[#allocation2 + $0x28] sm:$0xff]   ;;  %v2042_v42 = vld [vmem:[%s2929_s1 + $0x70] sm:$0xff]  }
  0x45   :  { %108 = vperm.xlu1 %2001, %v46_v43   ;;  %105 = vperm.xlu0 %2000, %v45_v44   ;;  %v3003_v43 = vmov 0  ;;  %v2044_v44 = vld [vmem:[#allocation2 + $0x70] sm:$0xff]  }
  0x49   :  { %156 = vperm.xlu1 %2001, %v62_v45   ;;  %153 = vperm.xlu0 %2000, %v61_v46   ;;  %v3005_v45 = vmov 0 }
  0x4d   :  { %114 = vperm.xlu1 %2001, %v48_v47   ;;  %111 = vperm.xlu0 %2000, %v47_v48   ;;  %v2043_v48 = vld [vmem:[%s2929_s1 + $0x30] sm:$0xff]  }
  0x51   :  { %162 = vperm.xlu1 %2001, %v64_v49   ;;  %159 = vperm.xlu0 %2000, %v63_v50   ;;  %v2045_v49 = vld [vmem:[#allocation2 + $0x30] sm:$0xff]   ;;  %v3007_v50 = vmov 0 }
  0x94   :  { %v118_v53 = vpop.permute.xlu1 %117  ;;  %v70_v54 = vpop.permute.xlu0 %69 }
  0x95   :  { %vm196_vm0 = vcmp.eq.s32.totalorder %v2290_v52, %v118_v53  ;;  %vm164_vm4 = vcmp.eq.s32.totalorder %v2290_v52, %v70_v54  ;;  %vm165_vm7 = vcmp.eq.s32.totalorder %v2293_v55, %v70_v54  ;;  %vm197_vm9 = vcmp.eq.s32.totalorder %v2293_v55, %v118_v53  ;;  %v2048_v54 = vld [vmem:[#allocation2 + $0x78] sm:$0xff]  }
  0x96   :  { %v3009_v53 = vmov 0 }
  0x98   :  { %v121_v56 = vpop.permute.xlu1 %120  ;;  %v73_v57 = vpop.permute.xlu0 %72 }
  0x99   :  { %vm198_vm1 = vcmp.eq.s32.totalorder %v2290_v52, %v121_v56  ;;  %vm166_vm2 = vcmp.eq.s32.totalorder %v2290_v52, %v73_v57  ;;  %vm167_vm3 = vcmp.eq.s32.totalorder %v2293_v55, %v73_v57  ;;  %vm199_vm5 = vcmp.eq.s32.totalorder %v2293_v55, %v121_v56 }
  0x9a   :  { %vm2301_vm6 = vmpackc.low %vm198_vm1, %vm196_vm0 }
  0x9b   :  { %v2978_v58 = vsel %vm2301_vm6, 4294967295, %v2977_v58  ;;  %vm2306_vm8 = vmpackc.low %vm166_vm2, %vm164_vm4 }
  0x9c   :  { %vm2314_vm10 = vmpackc.low %vm167_vm3, %vm165_vm7  ;;  %v79_v62 = vpop.permute.xlu1 %78  ;;  %v76_v63 = vpop.permute.xlu0 %75 }
  0x9d   :  { %1417 = vmatprep.mubr.msk.bf16.mxu0 %vm2314_vm10, %v2102_v1  ;;  %vm2321_vm11 = vmpackc.low %vm199_vm5, %vm197_vm9  ;;  %vm171_vm12 = vcmp.eq.s32.totalorder %v2293_v55, %v79_v62  ;;  %vm169_vm13 = vcmp.eq.s32.totalorder %v2293_v55, %v76_v63  ;;  %vm170_vm3 = vcmp.eq.s32.totalorder %v2290_v52, %v79_v62  ;;  %vm168_vm4 = vcmp.eq.s32.totalorder %v2290_v52, %v76_v63  ;;  %v2049_v62 = vld [vmem:[#allocation2 + $0x38] sm:$0xff]  }
  0x9e   :  { %v2984_v2 = vsel %vm2321_vm11, 4294967295, %v2983_v2  ;;  %1449 = vmatprep.mubr.msk.bf16.mxu1 %vm2321_vm11, %v2102_v1  ;;  %1419 = vmatmul.mubr.msk.bf16.vlgmr.msra.gmra.mrb[0].mxu0 %vm2306_vm8, %v2102_v1  ;;  %vm2336_vm14 = vmpackc.low %vm171_vm12, %vm169_vm13  ;;  %v3011_v63 = vmov 0 }
  0x9f   :  { %1451 = vmatmul.mubr.msk.bf16.vlgmr.msra.gmra.mrb[0].mxu1 %vm2301_vm6, %v2102_v1  ;;  %1865 = vmatpush3.bf16.msra.mxu0 %v2019_v60  ;;  %vm2372_vm9 = vmpackc.low %vm170_vm3, %vm168_vm4  ;;  %v2047_v60 = vld [vmem:[%s2929_s1 + $0x38] sm:$0xff]   ;;  %s2103_s1 = smov [#allocation5]  }
  0xa0   :  { %1753 = vmatpush3.bf16.msra.mxu1 %v2021_v0  ;;  %1421 = vmatprep.mubr.msk.bf16.mxu0 %vm2336_vm14, %v2102_v1  ;;  %v127_v7 = vpop.permute.xlu1 %126  ;;  %v124_v8 = vpop.permute.xlu0 %123  ;;  %v3013_v0 = vmov 0  ;;  %s1324_s18 = sshll.u32 %s2103_s1, 4  ;;  %s1325_s18 = int_to_ptr.vmem [resolvable:$true] %s1324_s18 }
  0xa1   :  { %vm202_vm15 = vcmp.eq.s32.totalorder %v2290_v52, %v127_v7  ;;  %vm203_vm0 = vcmp.eq.s32.totalorder %v2293_v55, %v127_v7  ;;  %vm200_vm1 = vcmp.eq.s32.totalorder %v2290_v52, %v124_v8  ;;  %vm201_vm2 = vcmp.eq.s32.totalorder %v2293_v55, %v124_v8  ;;  %1866 = vmatprep.subr.bf16.mxu0 %v2022_v3  ;;  %s2072_s19 = scalar_lea.vmem %s1325_s18, 4096  ;;  %p2077_p9 = scmp.lt.s32.totalorder %s1325_s18, %s1325_s18 }
  0xa2   :  { %vm2358_vm5 = vmpackc.low %vm203_vm0, %vm201_vm2  ;;  %1754 = vmatprep.subr.bf16.mxu1 %v2024_v5  ;;  %v3017_v7 = vmov 0  ;;  %p2073_p8 = scmp.ne.s32.totalorder %s1325_s18, %s2072_s19  ;;  %p2078_p10 = scmp.lt.s32.totalorder %s2072_s19, %s2072_s19 }
  0xa3   :  { %v2988_v12 = vsel %vm2358_vm5, 4294967295, %v2987_v12  ;;  %1453 = vmatprep.mubr.msk.bf16.mxu1 %vm2358_vm5, %v2102_v1  ;;  %1867 = vmatpush3.bf16.msra.mxu0 %v2023_v6  ;;  %vm2365_vm7 = vmpackc.low %vm202_vm15, %vm200_vm1  ;;  %v3015_v6 = vmov 0 }
  0xa4   :  { %v2990_v13 = vsel %vm2365_vm7, 4294967295, %v2989_v13  ;;  %v85_v14 = vpop.permute.xlu1 %84  ;;  %v82_v15 = vpop.permute.xlu0 %81  ;;  %1755 = vmatpush3.bf16.msra.mxu1 %v2025_v9  ;;  %1868 = vmatprep.subr.bf16.mxu0 %v2026_v10  ;;  %v3019_v10 = vmov 0  ;;  %p2079_p11 = por %p2078_p10, %p2077_p9 }
  0xa5   :  { %vm175_vm12 = vcmp.eq.s32.totalorder %v2293_v55, %v85_v14  ;;  %vm173_vm13 = vcmp.eq.s32.totalorder %v2293_v55, %v82_v15  ;;  %1756 = vmatprep.subr.bf16.mxu1 %v2028_v11  ;;  %vm174_vm4 = vcmp.eq.s32.totalorder %v2290_v52, %v85_v14  ;;  %v3021_v11 = vmov 0 }
  0xa6   :  { %1423 = vmatmul.mubr.msk.bf16.gmra.mrb[4].mxu0 %vm2372_vm9, %v2102_v1  ;;  %vm2384_vm15 = vmpackc.low %vm175_vm12, %vm173_vm13  ;;  %vm172_vm12 = vcmp.eq.s32.totalorder %v2290_v52, %v82_v15  ;;  %p2080_p12 = pnand %p2079_p11, %p2073_p8 }
  0xa7   :  { %1455 = vmatmul.mubr.msk.bf16.gmra.mrb[4].mxu1 %vm2365_vm7, %v2102_v1  ;;  %1425 = vmatprep.mubr.msk.bf16.mxu0 %vm2384_vm15, %v2102_v1 }
  0xa8   :  { %v133_v22 = vpop.permute.xlu1 %132  ;;  %v130_v23 = vpop.permute.xlu0 %129  ;;  %1869 = vmatpush3.bf16.msra.mxu0 %v2027_v16  ;;  %1757 = vmatpush3.bf16.msra.mxu1 %v2029_v17  ;;  %v3023_v16 = vmov 0  ;;  %v3025_v17 = vmov 0 }
  0xa9   :  { %vm206_vm0 = vcmp.eq.s32.totalorder %v2290_v52, %v133_v22  ;;  %vm207_vm1 = vcmp.eq.s32.totalorder %v2293_v55, %v133_v22  ;;  %vm204_vm2 = vcmp.eq.s32.totalorder %v2290_v52, %v130_v23  ;;  %vm205_vm3 = vcmp.eq.s32.totalorder %v2293_v55, %v130_v23  ;;  %1870 = vmatprep.subr.bf16.mxu0 %v2030_v19 }
  0xaa   :  { %vm2406_vm13 = vmpackc.low %vm207_vm1, %vm205_vm3  ;;  %1758 = vmatprep.subr.bf16.mxu1 %v2032_v21  ;;  %v3027_v22 = vmov 0  ;;  %v3029_v23 = vmov 0 }
  0xab   :  { %v2996_v27 = vsel %vm2406_vm13, 4294967295, %v2995_v27  ;;  %1457 = vmatprep.mubr.msk.bf16.mxu1 %vm2406_vm13, %v2102_v1  ;;  %vm2413_vm7 = vmpackc.low %vm206_vm0, %vm204_vm2 }
  0xac   :  { %v2998_v29 = vsel %vm2413_vm7, 4294967295, %v2997_v29  ;;  %v91_v30 = vpop.permute.xlu1 %90  ;;  %v88_v31 = vpop.permute.xlu0 %87  ;;  %1871 = vmatpush3.bf16.msra.mxu0 %v2031_v24  ;;  %1759 = vmatpush3.bf16.msra.mxu1 %v2033_v25  ;;  %vm2420_vm1 = vmpackc.low %vm174_vm4, %vm172_vm12 }
  0xad   :  { %vm179_vm3 = vcmp.eq.s32.totalorder %v2293_v55, %v91_v30  ;;  %vm177_vm0 = vcmp.eq.s32.totalorder %v2293_v55, %v88_v31  ;;  %1872 = vmatprep.subr.bf16.mxu0 %v2034_v26  ;;  %1760 = vmatprep.subr.bf16.mxu1 %v2036_v28  ;;  %vm176_vm13 = vcmp.eq.s32.totalorder %v2290_v52, %v88_v31  ;;  %v3033_v28 = vmov 0 }
  0xae   :  { %1427 = vmatmul.mubr.msk.bf16.gmra.mrb[8].mxu0 %vm2420_vm1, %v2102_v1  ;;  %vm2432_vm2 = vmpackc.low %vm179_vm3, %vm177_vm0 }
  0xaf   :  { %v3002_v36 = vsel %vm2432_vm2, 4294967295, %v3001_v36  ;;  %1459 = vmatmul.mubr.msk.bf16.gmra.mrb[8].mxu1 %vm2413_vm7, %v2102_v1  ;;  %1429 = vmatprep.mubr.msk.bf16.mxu0 %vm2432_vm2, %v2102_v1  ;;  %vm178_vm7 = vcmp.eq.s32.totalorder %v2290_v52, %v91_v30 }
  0xb0   :  { %v139_v38 = vpop.permute.xlu1 %138  ;;  %v136_v39 = vpop.permute.xlu0 %135  ;;  %1873 = vmatpush3.bf16.msra.mxu0 %v2035_v32  ;;  %1761 = vmatpush3.bf16.msra.mxu1 %v2037_v33 }
  0xb1   :  { %vm210_vm4 = vcmp.eq.s32.totalorder %v2290_v52, %v139_v38  ;;  %vm211_vm12 = vcmp.eq.s32.totalorder %v2293_v55, %v139_v38  ;;  %vm208_vm3 = vcmp.eq.s32.totalorder %v2290_v52, %v136_v39  ;;  %vm209_vm0 = vcmp.eq.s32.totalorder %v2293_v55, %v136_v39  ;;  %1874 = vmatprep.subr.bf16.mxu0 %v2038_v35 }
  0xb2   :  { %vm2454_vm5 = vmpackc.low %vm211_vm12, %vm209_vm0  ;;  %1762 = vmatprep.subr.bf16.mxu1 %v2040_v37 }
  0xb3   :  { %v3004_v43 = vsel %vm2454_vm5, 4294967295, %v3003_v43  ;;  %1461 = vmatprep.mubr.msk.bf16.mxu1 %vm2454_vm5, %v2102_v1  ;;  %vm2461_vm6 = vmpackc.low %vm210_vm4, %vm208_vm3 }
  0xb4   :  { %v3006_v45 = vsel %vm2461_vm6, 4294967295, %v3005_v45  ;;  %v97_v46 = vpop.permute.xlu1 %96  ;;  %v94_v47 = vpop.permute.xlu0 %93  ;;  %1875 = vmatpush3.bf16.msra.mxu0 %v2039_v40  ;;  %1763 = vmatpush3.bf16.msra.mxu1 %v2041_v41  ;;  %vm2468_vm12 = vmpackc.low %vm178_vm7, %vm176_vm13 }
  0xb5   :  { %v3008_v50 = vsel %vm2468_vm12, 4294967295, %v3007_v50  ;;  %vm183_vm0 = vcmp.eq.s32.totalorder %v2293_v55, %v97_v46  ;;  %vm181_vm4 = vcmp.eq.s32.totalorder %v2293_v55, %v94_v47  ;;  %1876 = vmatprep.subr.bf16.mxu0 %v2042_v42  ;;  %1764 = vmatprep.subr.bf16.mxu1 %v2044_v44  ;;  %vm180_vm5 = vcmp.eq.s32.totalorder %v2290_v52, %v94_v47 }
  0xb6   :  { %1431 = vmatmul.mubr.msk.bf16.gmra.mrb[12].mxu0 %vm2468_vm12, %v2102_v1  ;;  %vm2480_vm3 = vmpackc.low %vm183_vm0, %vm181_vm4 }
  0xb7   :  { %v3010_v53 = vsel %vm2480_vm3, 4294967295, %v3009_v53  ;;  %1463 = vmatmul.mubr.msk.bf16.gmra.mrb[12].mxu1 %vm2461_vm6, %v2102_v1  ;;  %1433 = vmatprep.mubr.msk.bf16.mxu0 %vm2480_vm3, %v2102_v1  ;;  %vm182_vm6 = vcmp.eq.s32.totalorder %v2290_v52, %v97_v46 }
  0xb8   :  { %v145_v56 = vpop.permute.xlu1 %144  ;;  %v142_v57 = vpop.permute.xlu0 %141  ;;  %1877 = vmatpush3.bf16.msra.mxu0 %v2043_v48  ;;  %1765 = vmatpush3.bf16.msra.mxu1 %v2045_v49  ;;  %vm2510_vm12 = vmpackc.low %vm182_vm6, %vm180_vm5 }
  0xb9   :  { %vm214_vm7 = vcmp.eq.s32.totalorder %v2290_v52, %v145_v56  ;;  %vm215_vm13 = vcmp.eq.s32.totalorder %v2293_v55, %v145_v56  ;;  %vm212_vm0 = vcmp.eq.s32.totalorder %v2290_v52, %v142_v57  ;;  %vm213_vm4 = vcmp.eq.s32.totalorder %v2293_v55, %v142_v57  ;;  %1878 = vmatprep.subr.bf16.mxu0 %v2046_v51 }
  0xba   :  { %vm2499_vm11 = vmpackc.low %vm215_vm13, %vm213_vm4  ;;  %1766 = vmatprep.subr.bf16.mxu1 %v2048_v54  ;;  %v3016_v6 = vsel %vm2510_vm12, 4294967295, %v3015_v6 }
  0xbb   :  { %v3012_v63 = vsel %vm2499_vm11, 4294967295, %v3011_v63  ;;  %1465 = vmatprep.mubr.msk.bf16.mxu1 %vm2499_vm11, %v2102_v1  ;;  %vm2506_vm3 = vmpackc.low %vm214_vm7, %vm212_vm0 }
  0xbc   :  { %v3014_v0 = vsel %vm2506_vm3, 4294967295, %v3013_v0  ;;  %v103_v3 = vpop.permute.xlu1 %102  ;;  %v100_v5 = vpop.permute.xlu0 %99  ;;  %1879 = vmatpush3.bf16.msra.mxu0 %v2047_v60  ;;  %1767 = vmatpush3.bf16.msra.mxu1 %v2049_v62 }
  0xbd   :  { %vm187_vm13 = vcmp.eq.s32.totalorder %v2293_v55, %v103_v3  ;;  %vm185_vm4 = vcmp.eq.s32.totalorder %v2293_v55, %v100_v5  ;;  %vm184_vm11 = vcmp.eq.s32.totalorder %v2290_v52, %v100_v5 }
  0xbe   :  { %1435 = vmatmul.mubr.msk.bf16.gmra.mrb[16].mxu0 %vm2510_vm12, %v2102_v1  ;;  %vm2519_vm7 = vmpackc.low %vm187_vm13, %vm185_vm4  ;;  %vm186_vm4 = vcmp.eq.s32.totalorder %v2290_v52, %v103_v3 }
  0xbf   :  { %v3018_v7 = vsel %vm2519_vm7, 4294967295, %v3017_v7  ;;  %1467 = vmatmul.mubr.msk.bf16.gmra.mrb[16].mxu1 %vm2506_vm3, %v2102_v1  ;;  %1437 = vmatprep.mubr.msk.bf16.mxu0 %vm2519_vm7, %v2102_v1  ;;  %vm2546_vm7 = vmpackc.low %vm186_vm4, %vm184_vm11 }
  0xc0   :  { %v151_v8 = vpop.permute.xlu1 %150  ;;  %v148_v9 = vpop.permute.xlu0 %147  ;;  %v3024_v16 = vsel %vm2546_vm7, 4294967295, %v3023_v16 }
  0xc1   :  { %vm218_vm6 = vcmp.eq.s32.totalorder %v2290_v52, %v151_v8  ;;  %vm219_vm5 = vcmp.eq.s32.totalorder %v2293_v55, %v151_v8  ;;  %vm216_vm0 = vcmp.eq.s32.totalorder %v2290_v52, %v148_v9  ;;  %vm217_vm13 = vcmp.eq.s32.totalorder %v2293_v55, %v148_v9 }
  0xc2   :  { %vm2535_vm12 = vmpackc.low %vm219_vm5, %vm217_vm13 }
  0xc3   :  { %v3020_v10 = vsel %vm2535_vm12, 4294967295, %v3019_v10  ;;  %1469 = vmatprep.mubr.msk.bf16.mxu1 %vm2535_vm12, %v2102_v1  ;;  %vm2542_vm3 = vmpackc.low %vm218_vm6, %vm216_vm0 }
  0xc4   :  { %v3022_v11 = vsel %vm2542_vm3, 4294967295, %v3021_v11  ;;  %v109_v14 = vpop.permute.xlu1 %108  ;;  %v106_v15 = vpop.permute.xlu0 %105 }
  0xc5   :  { %vm191_vm2 = vcmp.eq.s32.totalorder %v2293_v55, %v109_v14  ;;  %vm189_vm5 = vcmp.eq.s32.totalorder %v2293_v55, %v106_v15  ;;  %vm190_vm4 = vcmp.eq.s32.totalorder %v2290_v52, %v109_v14 }
  0xc6   :  { %1439 = vmatmul.mubr.msk.bf16.gmra.mrb[20].mxu0 %vm2546_vm7, %v2102_v1  ;;  %vm2555_vm13 = vmpackc.low %vm191_vm2, %vm189_vm5  ;;  %vm188_vm5 = vcmp.eq.s32.totalorder %v2290_v52, %v106_v15 }
  0xc7   :  { %v3026_v17 = vsel %vm2555_vm13, 4294967295, %v3025_v17  ;;  %1471 = vmatmul.mubr.msk.bf16.gmra.mrb[20].mxu1 %vm2542_vm3, %v2102_v1  ;;  %1441 = vmatprep.mubr.msk.bf16.mxu0 %vm2555_vm13, %v2102_v1  ;;  %vm2582_vm13 = vmpackc.low %vm190_vm4, %vm188_vm5 }
  0xc8   :  { %v157_v19 = vpop.permute.xlu1 %156  ;;  %v154_v21 = vpop.permute.xlu0 %153 }
  0xc9   :  { %vm222_vm11 = vcmp.eq.s32.totalorder %v2290_v52, %v157_v19  ;;  %vm223_vm6 = vcmp.eq.s32.totalorder %v2293_v55, %v157_v19  ;;  %vm220_vm0 = vcmp.eq.s32.totalorder %v2290_v52, %v154_v21  ;;  %vm221_vm2 = vcmp.eq.s32.totalorder %v2293_v55, %v154_v21 }
  0xca   :  { %vm2571_vm12 = vmpackc.low %vm223_vm6, %vm221_vm2 }
  0xcb   :  { %v3028_v22 = vsel %vm2571_vm12, 4294967295, %v3027_v22  ;;  %1473 = vmatprep.mubr.msk.bf16.mxu1 %vm2571_vm12, %v2102_v1  ;;  %vm2578_vm3 = vmpackc.low %vm222_vm11, %vm220_vm0 }
  0xcc   :  { %v3030_v23 = vsel %vm2578_vm3, 4294967295, %v3029_v23  ;;  %v115_v24 = vpop.permute.xlu1 %114  ;;  %v112_v25 = vpop.permute.xlu0 %111 }
  0xcd   :  { %vm195_vm7 = vcmp.eq.s32.totalorder %v2293_v55, %v115_v24  ;;  %vm193_vm6 = vcmp.eq.s32.totalorder %v2293_v55, %v112_v25  ;;  %vm194_vm5 = vcmp.eq.s32.totalorder %v2290_v52, %v115_v24 }
  0xce   :  { %1443 = vmatmul.mubr.msk.bf16.gmra.mrb[24].mxu0 %vm2582_vm13, %v2102_v1  ;;  %vm2591_vm2 = vmpackc.low %vm195_vm7, %vm193_vm6  ;;  %vm192_vm6 = vcmp.eq.s32.totalorder %v2290_v52, %v112_v25 }
  0xcf   :  { %v3034_v28 = vsel %vm2591_vm2, 4294967295, %v3033_v28  ;;  %1475 = vmatmul.mubr.msk.bf16.gmra.mrb[24].mxu1 %vm2578_vm3, %v2102_v1  ;;  %1445 = vmatprep.mubr.msk.bf16.mxu0 %vm2591_vm2, %v2102_v1  ;;  %vm2618_vm2 = vmpackc.low %vm194_vm5, %vm192_vm6  ;;  %vm3053_vm5 = vnez %v2996_v27  ;;  %vm3054_vm6 = vnez %v2998_v29 }
  0xd0   :  { %v163_v30 = vpop.permute.xlu1 %162  ;;  %v160_v31 = vpop.permute.xlu0 %159 }
  0xd1   :  { %vm226_vm11 = vcmp.eq.s32.totalorder %v2290_v52, %v163_v30  ;;  %vm227_vm0 = vcmp.eq.s32.totalorder %v2293_v55, %v163_v30  ;;  %vm224_vm4 = vcmp.eq.s32.totalorder %v2290_v52, %v160_v31  ;;  %vm225_vm7 = vcmp.eq.s32.totalorder %v2293_v55, %v160_v31 }
  0xd2   :  { %vm2607_vm12 = vmpackc.low %vm227_vm0, %vm225_vm7  ;;  %vm3048_vm0 = vnez %v3034_v28  ;;  %vm3051_vm7 = vnez %v2988_v12 }
  0xd3   :  { %1477 = vmatprep.mubr.msk.bf16.mxu1 %vm2607_vm12, %v2102_v1  ;;  %vm2614_vm3 = vmpackc.low %vm226_vm11, %vm224_vm4  ;;  %vm3047_vm11 = vnez %v3026_v17  ;;  %vm3049_vm4 = vnez %v2984_v2 }
  0xd6   :  { %1447 = vmatmul.mubr.msk.bf16.gmra.mrb[28].mxu0 %vm2618_vm2, %v2102_v1 }
  0xd7   :  { %1479 = vmatmul.mubr.msk.bf16.gmra.mrb[28].mxu1 %vm2614_vm3, %v2102_v1  ;;  %1577 = vmatprep.mubr.msk.bf16.mxu0 %vm2314_vm10, %v2102_v1 }
  0xd8   :  { %1497 = vmatprep.mubr.msk.bf16.mxu1 %vm2314_vm10, %v2102_v1  ;;  %vm3042_vm10 = vnez %v3008_v50 }
  0xde   :  { %1579 = vmatmul.mubr.msk.bf16.vlgmr.msra.gmra.mrb[32].mxu0 %vm2306_vm8, %v2102_v1 }
  0xdf   :  { %1499 = vmatmul.mubr.msk.bf16.vlgmr.msra.gmra.mrb[32].mxu1 %vm2306_vm8, %v2102_v1  ;;  %1581 = vmatprep.mubr.msk.bf16.mxu0 %vm2336_vm14, %v2102_v1  ;;  %vm3041_vm8 = vnez %v3002_v36 }
  0xe0   :  { %1501 = vmatprep.mubr.msk.bf16.mxu1 %vm2336_vm14, %v2102_v1  ;;  %vm3043_vm14 = vnez %v3010_v53 }
  0xe6   :  { %1583 = vmatmul.mubr.msk.bf16.gmra.mrb[36].mxu0 %vm2372_vm9, %v2102_v1 }
  0xe7   :  { %1503 = vmatmul.mubr.msk.bf16.gmra.mrb[36].mxu1 %vm2372_vm9, %v2102_v1  ;;  %1585 = vmatprep.mubr.msk.bf16.mxu0 %vm2384_vm15, %v2102_v1  ;;  %vm3044_vm9 = vnez %v3016_v6 }
  0xe8   :  { %1505 = vmatprep.mubr.msk.bf16.mxu1 %vm2384_vm15, %v2102_v1  ;;  %vm3045_vm15 = vnez %v3018_v7 }
  0xee   :  { %1587 = vmatmul.mubr.msk.bf16.gmra.mrb[40].mxu0 %vm2420_vm1, %v2102_v1 }
  0xef   :  { %1507 = vmatmul.mubr.msk.bf16.gmra.mrb[40].mxu1 %vm2420_vm1, %v2102_v1  ;;  %1589 = vmatprep.mubr.msk.bf16.mxu0 %vm3041_vm8, %v2102_v1  ;;  %vm3046_vm1 = vnez %v3024_v16 }
  0xf0   :  { %1509 = vmatprep.mubr.msk.bf16.mxu1 %vm3041_vm8, %v2102_v1  ;;  %vm3055_vm8 = vnez %v3004_v43 }
  0xf6   :  { %1591 = vmatmul.mubr.msk.bf16.gmra.mrb[44].mxu0 %vm3042_vm10, %v2102_v1 }
  0xf7   :  { %1511 = vmatmul.mubr.msk.bf16.gmra.mrb[44].mxu1 %vm3042_vm10, %v2102_v1  ;;  %1593 = vmatprep.mubr.msk.bf16.mxu0 %vm3043_vm14, %v2102_v1  ;;  %vm3056_vm10 = vnez %v3006_v45 }
  0xf8   :  { %1513 = vmatprep.mubr.msk.bf16.mxu1 %vm3043_vm14, %v2102_v1  ;;  %vm3057_vm14 = vnez %v3012_v63 }
  0xfe   :  { %1595 = vmatmul.mubr.msk.bf16.gmra.mrb[48].mxu0 %vm3044_vm9, %v2102_v1 }
  0xff   :  { %1515 = vmatmul.mubr.msk.bf16.gmra.mrb[48].mxu1 %vm3044_vm9, %v2102_v1  ;;  %1597 = vmatprep.mubr.msk.bf16.mxu0 %vm3045_vm15, %v2102_v1  ;;  %vm3058_vm9 = vnez %v3014_v0 }
 0x100   :  { %1517 = vmatprep.mubr.msk.bf16.mxu1 %vm3045_vm15, %v2102_v1  ;;  %vm3059_vm15 = vnez %v3020_v10 }
 0x106   :  { %1599 = vmatmul.mubr.msk.bf16.gmra.mrb[52].mxu0 %vm3046_vm1, %v2102_v1 }
 0x107   :  { %1519 = vmatmul.mubr.msk.bf16.gmra.mrb[52].mxu1 %vm3046_vm1, %v2102_v1  ;;  %1601 = vmatprep.mubr.msk.bf16.mxu0 %vm3047_vm11, %v2102_v1  ;;  %vm3060_vm1 = vnez %v3022_v11 }
 0x108   :  { %1521 = vmatprep.mubr.msk.bf16.mxu1 %vm3047_vm11, %v2102_v1  ;;  %vm3061_vm11 = vnez %v3028_v22 }
 0x10e   :  { %1603 = vmatmul.mubr.msk.bf16.gmra.mrb[56].mxu0 %vm2582_vm13, %v2102_v1 }
 0x10f   :  { %1523 = vmatmul.mubr.msk.bf16.gmra.mrb[56].mxu1 %vm2582_vm13, %v2102_v1  ;;  %1605 = vmatprep.mubr.msk.bf16.mxu0 %vm3048_vm0, %v2102_v1  ;;  %vm3050_vm13 = vnez %v2978_v58 }
 0x110   :  { %1525 = vmatprep.mubr.msk.bf16.mxu1 %vm3048_vm0, %v2102_v1  ;;  %vm3062_vm0 = vnez %v3030_v23 }
 0x116   :  { %1607 = vmatmul.mubr.msk.bf16.gmra.mrb[60].mxu0 %vm2618_vm2, %v2102_v1 }
 0x117   :  { %1527 = vmatmul.mubr.msk.bf16.gmra.mrb[60].mxu1 %vm2618_vm2, %v2102_v1  ;;  %1609 = vmatprep.mubr.msk.bf16.mxu0 %vm3049_vm4, %v2102_v1  ;;  %vm3052_vm2 = vnez %v2990_v13 }
 0x118   :  { %1529 = vmatprep.mubr.msk.bf16.mxu1 %vm3049_vm4, %v2102_v1 }
 0x11e   :  { %1611 = vmatmul.mubr.msk.bf16.gmra.mrb[64].mxu0 %vm3050_vm13, %v2102_v1 }
 0x11f   :  { %1531 = vmatmul.mubr.msk.bf16.gmra.mrb[64].mxu1 %vm3050_vm13, %v2102_v1  ;;  %1613 = vmatprep.mubr.msk.bf16.mxu0 %vm3051_vm7, %v2102_v1 }
 0x120   :  { %1533 = vmatprep.mubr.msk.bf16.mxu1 %vm3051_vm7, %v2102_v1 }
 0x126   :  { %1615 = vmatmul.mubr.msk.bf16.gmra.mrb[68].mxu0 %vm3052_vm2, %v2102_v1 }
 0x127   :  { %1535 = vmatmul.mubr.msk.bf16.gmra.mrb[68].mxu1 %vm3052_vm2, %v2102_v1  ;;  %1617 = vmatprep.mubr.msk.bf16.mxu0 %vm3053_vm5, %v2102_v1 }
 0x128   :  { %1537 = vmatprep.mubr.msk.bf16.mxu1 %vm3053_vm5, %v2102_v1 }
 0x12e   :  { %1619 = vmatmul.mubr.msk.bf16.gmra.mrb[72].mxu0 %vm3054_vm6, %v2102_v1 }
 0x12f   :  { %1539 = vmatmul.mubr.msk.bf16.gmra.mrb[72].mxu1 %vm3054_vm6, %v2102_v1  ;;  %1621 = vmatprep.mubr.msk.bf16.mxu0 %vm3055_vm8, %v2102_v1 }
 0x130   :  { %1541 = vmatprep.mubr.msk.bf16.mxu1 %vm3055_vm8, %v2102_v1 }
 0x136   :  { %1623 = vmatmul.mubr.msk.bf16.gmra.mrb[76].mxu0 %vm3056_vm10, %v2102_v1 }
 0x137   :  { %1543 = vmatmul.mubr.msk.bf16.gmra.mrb[76].mxu1 %vm3056_vm10, %v2102_v1  ;;  %1625 = vmatprep.mubr.msk.bf16.mxu0 %vm3057_vm14, %v2102_v1 }
 0x138   :  { %1545 = vmatprep.mubr.msk.bf16.mxu1 %vm3057_vm14, %v2102_v1 }
 0x13e   :  { %1627 = vmatmul.mubr.msk.bf16.gmra.mrb[80].mxu0 %vm3058_vm9, %v2102_v1 }
 0x13f   :  { %1547 = vmatmul.mubr.msk.bf16.gmra.mrb[80].mxu1 %vm3058_vm9, %v2102_v1  ;;  %1629 = vmatprep.mubr.msk.bf16.mxu0 %vm3059_vm15, %v2102_v1 }
 0x140   :  { %1549 = vmatprep.mubr.msk.bf16.mxu1 %vm3059_vm15, %v2102_v1 }
 0x146   :  { %1631 = vmatmul.mubr.msk.bf16.gmra.mrb[84].mxu0 %vm3060_vm1, %v2102_v1 }
 0x147   :  { %1551 = vmatmul.mubr.msk.bf16.gmra.mrb[84].mxu1 %vm3060_vm1, %v2102_v1  ;;  %1633 = vmatprep.mubr.msk.bf16.mxu0 %vm3061_vm11, %v2102_v1 }
 0x148   :  { %1553 = vmatprep.mubr.msk.bf16.mxu1 %vm3061_vm11, %v2102_v1 }
 0x14e   :  { %1635 = vmatmul.mubr.msk.bf16.gmra.mrb[88].mxu0 %vm3062_vm0, %v2102_v1 }
 0x14f   :  { %1555 = vmatmul.mubr.msk.bf16.gmra.mrb[88].mxu1 %vm3062_vm0, %v2102_v1  ;;  %1637 = vmatprep.mubr.msk.bf16.mxu0 %vm2607_vm12, %v2102_v1 }
 0x150   :  { %1557 = vmatprep.mubr.msk.bf16.mxu1 %vm2607_vm12, %v2102_v1 }
 0x156   :  { %1639 = vmatmul.mubr.msk.bf16.gmra.mrb[92].mxu0 %vm2614_vm3, %v2102_v1 }
 0x157   :  { %1559 = vmatmul.mubr.msk.bf16.gmra.mrb[92].mxu1 %vm2614_vm3, %v2102_v1 }
 0x171   :  { %v1656_v52 = vpop.f32.mrb[0].mxu0 }
 0x172   :  { %v1704_v55 = vpop.f32.mrb[0].mxu1  ;;  %v1657_v58 = vpop.f32.mrb[1].mxu0 }
 0x173   :  { %v2820_v59 = vadd.f32 %v1657_v58, %v1656_v52  ;;  %v1705_v61 = vpop.f32.mrb[1].mxu1  ;;  %v1659_v2 = vpop.f32.mrb[2].mxu0 }
 0x174   :  { %v2822_v4 = vadd.f32 %v1705_v61, %v1704_v55  ;;  %v1707_v12 = vpop.f32.mrb[2].mxu1  ;;  %v1660_v13 = vpop.f32.mrb[3].mxu0 }
 0x175   :  { %v2824_v18 = vadd.f32 %v1660_v13, %v1659_v2  ;;  %v1708_v20 = vpop.f32.mrb[3].mxu1 }
 0x176   :  { %v2826_v27 = vadd.f32 %v1708_v20, %v1707_v12 }
 0x179   :  { %v1662_v29 = vpop.f32.mrb[4].mxu0 }
 0x17a   :  { %v1710_v34 = vpop.f32.mrb[4].mxu1  ;;  %v1663_v36 = vpop.f32.mrb[5].mxu0 }
 0x17b   :  { %v2828_v1 = vadd.f32 %v1663_v36, %v1662_v29  ;;  %v1711_v37 = vpop.f32.mrb[5].mxu1  ;;  %v1665_v38 = vpop.f32.mrb[6].mxu0 }
 0x17c   :  { %v2830_v39 = vadd.f32 %v1711_v37, %v1710_v34  ;;  %v1713_v40 = vpop.f32.mrb[6].mxu1  ;;  %v1666_v41 = vpop.f32.mrb[7].mxu0 }
 0x17d   :  { %v2832_v42 = vadd.f32 %v1666_v41, %v1665_v38  ;;  %v1714_v43 = vpop.f32.mrb[7].mxu1 }
 0x17e   :  { %v2834_v44 = vadd.f32 %v1714_v43, %v1713_v40 }
 0x181   :  { %v1668_v45 = vpop.f32.mrb[8].mxu0 }
 0x182   :  { %v1716_v46 = vpop.f32.mrb[8].mxu1  ;;  %v1669_v47 = vpop.f32.mrb[9].mxu0 }
 0x183   :  { %v2836_v48 = vadd.f32 %v1669_v47, %v1668_v45  ;;  %v1717_v49 = vpop.f32.mrb[9].mxu1  ;;  %v1671_v50 = vpop.f32.mrb[10].mxu0 }
 0x184   :  { %v2838_v51 = vadd.f32 %v1717_v49, %v1716_v46  ;;  %v1719_v53 = vpop.f32.mrb[10].mxu1  ;;  %v1672_v54 = vpop.f32.mrb[11].mxu0 }
 0x185   :  { %v2840_v56 = vadd.f32 %v1672_v54, %v1671_v50  ;;  %v1720_v57 = vpop.f32.mrb[11].mxu1 }
 0x186   :  { %v2842_v60 = vadd.f32 %v1720_v57, %v1719_v53 }
 0x189   :  { %v1674_v62 = vpop.f32.mrb[12].mxu0 }
 0x18a   :  { %v1722_v63 = vpop.f32.mrb[12].mxu1  ;;  %v1675_v0 = vpop.f32.mrb[13].mxu0 }
 0x18b   :  { %v2844_v3 = vadd.f32 %v1675_v0, %v1674_v62  ;;  %v1723_v5 = vpop.f32.mrb[13].mxu1  ;;  %v1677_v6 = vpop.f32.mrb[14].mxu0 }
 0x18c   :  { %v2846_v7 = vadd.f32 %v1723_v5, %v1722_v63  ;;  %v1725_v8 = vpop.f32.mrb[14].mxu1  ;;  %v1678_v9 = vpop.f32.mrb[15].mxu0 }
 0x18d   :  { %v2848_v10 = vadd.f32 %v1678_v9, %v1677_v6  ;;  %v1726_v11 = vpop.f32.mrb[15].mxu1 }
 0x18e   :  { %v2850_v14 = vadd.f32 %v1726_v11, %v1725_v8 }
 0x191   :  { %v1680_v15 = vpop.f32.mrb[16].mxu0 }
 0x192   :  { %v1728_v16 = vpop.f32.mrb[16].mxu1  ;;  %v1681_v17 = vpop.f32.mrb[17].mxu0 }
 0x193   :  { %v2852_v19 = vadd.f32 %v1681_v17, %v1680_v15  ;;  %v1729_v21 = vpop.f32.mrb[17].mxu1  ;;  %v1683_v22 = vpop.f32.mrb[18].mxu0 }
 0x194   :  { %v2854_v23 = vadd.f32 %v1729_v21, %v1728_v16  ;;  %v1731_v24 = vpop.f32.mrb[18].mxu1  ;;  %v1684_v25 = vpop.f32.mrb[19].mxu0 }
 0x195   :  { %v2856_v26 = vadd.f32 %v1684_v25, %v1683_v22  ;;  %v1732_v28 = vpop.f32.mrb[19].mxu1 }
 0x196   :  { %v2858_v30 = vadd.f32 %v1732_v28, %v1731_v24 }
 0x199   :  { %v1686_v31 = vpop.f32.mrb[20].mxu0 }
 0x19a   :  { %v1734_v32 = vpop.f32.mrb[20].mxu1  ;;  %v1687_v33 = vpop.f32.mrb[21].mxu0 }
 0x19b   :  { %v2860_v35 = vadd.f32 %v1687_v33, %v1686_v31  ;;  %v1735_v52 = vpop.f32.mrb[21].mxu1  ;;  %v1689_v55 = vpop.f32.mrb[22].mxu0 }
 0x19c   :  { %v2862_v58 = vadd.f32 %v1735_v52, %v1734_v32  ;;  %v1737_v61 = vpop.f32.mrb[22].mxu1  ;;  %v1690_v2 = vpop.f32.mrb[23].mxu0 }
 0x19d   :  { %v2864_v12 = vadd.f32 %v1690_v2, %v1689_v55  ;;  %v1738_v13 = vpop.f32.mrb[23].mxu1 }
 0x19e   :  { %v2866_v20 = vadd.f32 %v1738_v13, %v1737_v61 }
 0x1a1   :  { %v1692_v29 = vpop.f32.mrb[24].mxu0 }
 0x1a2   :  { %v1740_v34 = vpop.f32.mrb[24].mxu1  ;;  %v1693_v36 = vpop.f32.mrb[25].mxu0 }
 0x1a3   :  { %v2868_v37 = vadd.f32 %v1693_v36, %v1692_v29  ;;  %v1741_v38 = vpop.f32.mrb[25].mxu1  ;;  %v1695_v40 = vpop.f32.mrb[26].mxu0 }
 0x1a4   :  { %v2870_v41 = vadd.f32 %v1741_v38, %v1740_v34  ;;  %v1743_v43 = vpop.f32.mrb[26].mxu1  ;;  %v1696_v45 = vpop.f32.mrb[27].mxu0 }
 0x1a5   :  { %v2872_v46 = vadd.f32 %v1696_v45, %v1695_v40  ;;  %v1744_v47 = vpop.f32.mrb[27].mxu1 }
 0x1a6   :  { %v2874_v49 = vadd.f32 %v1744_v47, %v1743_v43 }
 0x1a9   :  { %v1698_v50 = vpop.f32.mrb[28].mxu0 }
 0x1aa   :  { %v1746_v53 = vpop.f32.mrb[28].mxu1  ;;  %v1699_v54 = vpop.f32.mrb[29].mxu0 }
 0x1ab   :  { %v2876_v57 = vadd.f32 %v1699_v54, %v1698_v50  ;;  %v1747_v62 = vpop.f32.mrb[29].mxu1  ;;  %v1701_v63 = vpop.f32.mrb[30].mxu0 }
 0x1ac   :  { %v2878_v0 = vadd.f32 %v1747_v62, %v1746_v53  ;;  %v1749_v5 = vpop.f32.mrb[30].mxu1  ;;  %v1702_v6 = vpop.f32.mrb[31].mxu0 }
 0x1ad   :  { %v2880_v8 = vadd.f32 %v1702_v6, %v1701_v63  ;;  %v1750_v9 = vpop.f32.mrb[31].mxu1 }
 0x1ae   :  { %v2882_v11 = vadd.f32 %v1750_v9, %v1749_v5 }
 0x1b1   :  { %v1880_v15 = vpop.f32.mrb[32].mxu0 }
 0x1b2   :  { %v1768_v16 = vpop.f32.mrb[32].mxu1  ;;  %v1881_v17 = vpop.f32.mrb[33].mxu0 }
 0x1b3   :  { %v1769_v21 = vpop.f32.mrb[33].mxu1  ;;  %v1882_v22 = vadd.f32 %v1881_v17, %v1880_v15  ;;  %v1883_v24 = vpop.f32.mrb[34].mxu0 }
 0x1b4   :  { %v1770_v25 = vadd.f32 %v1769_v21, %v1768_v16  ;;  %v1771_v28 = vpop.f32.mrb[34].mxu1  ;;  %v1884_v31 = vpop.f32.mrb[35].mxu0 }
 0x1b5   :  { %v1129_v32 = vadd.f32 %v1882_v22, %v2820_v59  ;;  %v1772_v33 = vpop.f32.mrb[35].mxu1  ;;  %v1885_v52 = vadd.f32 %v1884_v31, %v1883_v24 }
 0x1b6   :  { %v1773_v55 = vadd.f32 %v1772_v33, %v1771_v28 }
 0x1b7   :  { %v1255_v61 = vadd.f32 %v1770_v25, %v1129_v32  ;;  %v1132_v2 = vadd.f32 %v1885_v52, %v2824_v18 }
 0x1b9   :  { %1287 = vst [vmem:[#allocation5] sm:$0xff] %v1255_v61  ;;  %v1256_v13 = vadd.f32 %v1773_v55, %v1132_v2  ;;  %v1886_v29 = vpop.f32.mrb[36].mxu0 }
 0x1ba   :  { %v1774_v34 = vpop.f32.mrb[36].mxu1  ;;  %v1887_v36 = vpop.f32.mrb[37].mxu0 }
 0x1bb   :  { %1288 = vst [vmem:[#allocation5 + $0x8] sm:$0xff] %v1256_v13  ;;  %v1775_v38 = vpop.f32.mrb[37].mxu1  ;;  %v1888_v40 = vadd.f32 %v1887_v36, %v1886_v29  ;;  %v1889_v43 = vpop.f32.mrb[38].mxu0 }
 0x1bc   :  { %v1776_v45 = vadd.f32 %v1775_v38, %v1774_v34  ;;  %v1777_v47 = vpop.f32.mrb[38].mxu1  ;;  %v1890_v50 = vpop.f32.mrb[39].mxu0 }
 0x1bd   :  { %v1137_v59 = vadd.f32 %v1888_v40, %v2828_v1  ;;  %v1778_v53 = vpop.f32.mrb[39].mxu1  ;;  %v1891_v54 = vadd.f32 %v1890_v50, %v1889_v43 }
 0x1be   :  { %v1779_v62 = vadd.f32 %v1778_v53, %v1777_v47 }
 0x1bf   :  { %v1257_v63 = vadd.f32 %v1776_v45, %v1137_v59  ;;  %v1140_v18 = vadd.f32 %v1891_v54, %v2832_v42 }
 0x1c1   :  { %1289 = vst [vmem:[#allocation5 + $0x10] sm:$0xff] %v1257_v63  ;;  %v1258_v5 = vadd.f32 %v1779_v62, %v1140_v18  ;;  %v1892_v6 = vpop.f32.mrb[40].mxu0 }
 0x1c2   :  { %v1780_v9 = vpop.f32.mrb[40].mxu1  ;;  %v1893_v15 = vpop.f32.mrb[41].mxu0 }
 0x1c3   :  { %1290 = vst [vmem:[#allocation5 + $0x18] sm:$0xff] %v1258_v5  ;;  %v1781_v16 = vpop.f32.mrb[41].mxu1  ;;  %v1894_v17 = vadd.f32 %v1893_v15, %v1892_v6  ;;  %v1895_v21 = vpop.f32.mrb[42].mxu0 }
 0x1c4   :  { %v1782_v22 = vadd.f32 %v1781_v16, %v1780_v9  ;;  %v1783_v24 = vpop.f32.mrb[42].mxu1  ;;  %v1896_v25 = vpop.f32.mrb[43].mxu0 }
 0x1c5   :  { %v1145_v1 = vadd.f32 %v1894_v17, %v2836_v48  ;;  %v1784_v28 = vpop.f32.mrb[43].mxu1  ;;  %v1897_v31 = vadd.f32 %v1896_v25, %v1895_v21 }
 0x1c6   :  { %v1785_v32 = vadd.f32 %v1784_v28, %v1783_v24 }
 0x1c7   :  { %v1259_v33 = vadd.f32 %v1782_v22, %v1145_v1  ;;  %v1148_v42 = vadd.f32 %v1897_v31, %v2840_v56 }
 0x1c9   :  { %1291 = vst [vmem:[#allocation5 + $0x20] sm:$0xff] %v1259_v33  ;;  %v1260_v52 = vadd.f32 %v1785_v32, %v1148_v42  ;;  %v1898_v55 = vpop.f32.mrb[44].mxu0 }
 0x1ca   :  { %v1786_v61 = vpop.f32.mrb[44].mxu1  ;;  %v1899_v2 = vpop.f32.mrb[45].mxu0 }
 0x1cb   :  { %1292 = vst [vmem:[#allocation5 + $0x28] sm:$0xff] %v1260_v52  ;;  %v1787_v13 = vpop.f32.mrb[45].mxu1  ;;  %v1900_v29 = vadd.f32 %v1899_v2, %v1898_v55  ;;  %v1901_v34 = vpop.f32.mrb[46].mxu0 }
 0x1cc   :  { %v1788_v36 = vadd.f32 %v1787_v13, %v1786_v61  ;;  %v1789_v38 = vpop.f32.mrb[46].mxu1  ;;  %v1902_v40 = vpop.f32.mrb[47].mxu0 }
 0x1cd   :  { %v1153_v48 = vadd.f32 %v1900_v29, %v2844_v3  ;;  %v1790_v43 = vpop.f32.mrb[47].mxu1  ;;  %v1903_v45 = vadd.f32 %v1902_v40, %v1901_v34 }
 0x1ce   :  { %v1791_v47 = vadd.f32 %v1790_v43, %v1789_v38 }
 0x1cf   :  { %v1261_v50 = vadd.f32 %v1788_v36, %v1153_v48  ;;  %v1156_v56 = vadd.f32 %v1903_v45, %v2848_v10 }
 0x1d1   :  { %1293 = vst [vmem:[#allocation5 + $0x30] sm:$0xff] %v1261_v50  ;;  %v1262_v59 = vadd.f32 %v1791_v47, %v1156_v56  ;;  %v1904_v53 = vpop.f32.mrb[48].mxu0 }
 0x1d2   :  { %v1792_v54 = vpop.f32.mrb[48].mxu1  ;;  %v1905_v62 = vpop.f32.mrb[49].mxu0 }
 0x1d3   :  { %1294 = vst [vmem:[#allocation5 + $0x38] sm:$0xff] %v1262_v59  ;;  %v1793_v63 = vpop.f32.mrb[49].mxu1  ;;  %v1906_v18 = vadd.f32 %v1905_v62, %v1904_v53  ;;  %v1907_v5 = vpop.f32.mrb[50].mxu0 }
 0x1d4   :  { %v1794_v6 = vadd.f32 %v1793_v63, %v1792_v54  ;;  %v1795_v9 = vpop.f32.mrb[50].mxu1  ;;  %v1908_v15 = vpop.f32.mrb[51].mxu0 }
 0x1d5   :  { %v1161_v3 = vadd.f32 %v1906_v18, %v2852_v19  ;;  %v1796_v16 = vpop.f32.mrb[51].mxu1  ;;  %v1909_v17 = vadd.f32 %v1908_v15, %v1907_v5 }
 0x1d6   :  { %v1797_v21 = vadd.f32 %v1796_v16, %v1795_v9 }
 0x1d7   :  { %v1263_v22 = vadd.f32 %v1794_v6, %v1161_v3  ;;  %v1164_v10 = vadd.f32 %v1909_v17, %v2856_v26 }
 0x1d9   :  { %1295 = vst [vmem:[#allocation5 + $0x40] sm:$0xff] %v1263_v22  ;;  %v1264_v24 = vadd.f32 %v1797_v21, %v1164_v10  ;;  %v1910_v25 = vpop.f32.mrb[52].mxu0 }
 0x1da   :  { %v1798_v1 = vpop.f32.mrb[52].mxu1  ;;  %v1911_v28 = vpop.f32.mrb[53].mxu0 }
 0x1db   :  { %1296 = vst [vmem:[#allocation5 + $0x48] sm:$0xff] %v1264_v24  ;;  %v1799_v31 = vpop.f32.mrb[53].mxu1  ;;  %v1912_v32 = vadd.f32 %v1911_v28, %v1910_v25  ;;  %v1913_v33 = vpop.f32.mrb[54].mxu0 }
 0x1dc   :  { %v1800_v42 = vadd.f32 %v1799_v31, %v1798_v1  ;;  %v1801_v52 = vpop.f32.mrb[54].mxu1  ;;  %v1914_v55 = vpop.f32.mrb[55].mxu0 }
 0x1dd   :  { %v1169_v19 = vadd.f32 %v1912_v32, %v2860_v35  ;;  %v1802_v61 = vpop.f32.mrb[55].mxu1  ;;  %v1915_v2 = vadd.f32 %v1914_v55, %v1913_v33 }
 0x1de   :  { %v1803_v13 = vadd.f32 %v1802_v61, %v1801_v52 }
 0x1df   :  { %v1265_v29 = vadd.f32 %v1800_v42, %v1169_v19  ;;  %v1172_v26 = vadd.f32 %v1915_v2, %v2864_v12 }
 0x1e1   :  { %1297 = vst [vmem:[#allocation5 + $0x50] sm:$0xff] %v1265_v29  ;;  %v1266_v34 = vadd.f32 %v1803_v13, %v1172_v26  ;;  %v1916_v36 = vpop.f32.mrb[56].mxu0 }
 0x1e2   :  { %v1804_v38 = vpop.f32.mrb[56].mxu1  ;;  %v1917_v40 = vpop.f32.mrb[57].mxu0 }
 0x1e3   :  { %1298 = vst [vmem:[#allocation5 + $0x58] sm:$0xff] %v1266_v34  ;;  %v1805_v48 = vpop.f32.mrb[57].mxu1  ;;  %v1918_v43 = vadd.f32 %v1917_v40, %v1916_v36  ;;  %v1919_v45 = vpop.f32.mrb[58].mxu0 }
 0x1e4   :  { %v1806_v47 = vadd.f32 %v1805_v48, %v1804_v38  ;;  %v1807_v50 = vpop.f32.mrb[58].mxu1  ;;  %v1920_v56 = vpop.f32.mrb[59].mxu0 }
 0x1e5   :  { %v1177_v35 = vadd.f32 %v1918_v43, %v2868_v37  ;;  %v1808_v59 = vpop.f32.mrb[59].mxu1  ;;  %v1921_v53 = vadd.f32 %v1920_v56, %v1919_v45 }
 0x1e6   :  { %v1809_v54 = vadd.f32 %v1808_v59, %v1807_v50 }
 0x1e7   :  { %v1267_v62 = vadd.f32 %v1806_v47, %v1177_v35  ;;  %v1180_v12 = vadd.f32 %v1921_v53, %v2872_v46 }
 0x1e9   :  { %1299 = vst [vmem:[#allocation5 + $0x60] sm:$0xff] %v1267_v62  ;;  %v1268_v63 = vadd.f32 %v1809_v54, %v1180_v12  ;;  %v1922_v18 = vpop.f32.mrb[60].mxu0 }
 0x1ea   :  { %v1810_v5 = vpop.f32.mrb[60].mxu1  ;;  %v1923_v6 = vpop.f32.mrb[61].mxu0 }
 0x1eb   :  { %1300 = vst [vmem:[#allocation5 + $0x68] sm:$0xff] %v1268_v63  ;;  %v1811_v9 = vpop.f32.mrb[61].mxu1  ;;  %v1924_v15 = vadd.f32 %v1923_v6, %v1922_v18  ;;  %v1925_v3 = vpop.f32.mrb[62].mxu0 }
 0x1ec   :  { %v1812_v16 = vadd.f32 %v1811_v9, %v1810_v5  ;;  %v1813_v17 = vpop.f32.mrb[62].mxu1  ;;  %v1926_v21 = vpop.f32.mrb[63].mxu0 }
 0x1ed   :  { %v1185_v37 = vadd.f32 %v1924_v15, %v2876_v57  ;;  %v1814_v22 = vpop.f32.mrb[63].mxu1  ;;  %v1927_v10 = vadd.f32 %v1926_v21, %v1925_v3 }
 0x1ee   :  { %v1815_v24 = vadd.f32 %v1814_v22, %v1813_v17 }
 0x1ef   :  { %v1269_v25 = vadd.f32 %v1812_v16, %v1185_v37  ;;  %v1188_v46 = vadd.f32 %v1927_v10, %v2880_v8 }
 0x1f1   :  { %1301 = vst [vmem:[#allocation5 + $0x70] sm:$0xff] %v1269_v25  ;;  %v1270_v1 = vadd.f32 %v1815_v24, %v1188_v46  ;;  %v1928_v28 = vpop.f32.mrb[64].mxu0 }
 0x1f2   :  { %v1816_v31 = vpop.f32.mrb[64].mxu1  ;;  %v1929_v32 = vpop.f32.mrb[65].mxu0 }
 0x1f3   :  { %1302 = vst [vmem:[#allocation5 + $0x78] sm:$0xff] %v1270_v1  ;;  %v1817_v33 = vpop.f32.mrb[65].mxu1  ;;  %v1930_v42 = vadd.f32 %v1929_v32, %v1928_v28  ;;  %v1931_v52 = vpop.f32.mrb[66].mxu0 }
 0x1f4   :  { %v1818_v55 = vadd.f32 %v1817_v33, %v1816_v31  ;;  %v1819_v19 = vpop.f32.mrb[66].mxu1  ;;  %v1932_v61 = vpop.f32.mrb[67].mxu0 }
 0x1f5   :  { %v1193_v57 = vadd.f32 %v1930_v42, %v2822_v4  ;;  %v1820_v2 = vpop.f32.mrb[67].mxu1  ;;  %v1933_v13 = vadd.f32 %v1932_v61, %v1931_v52 }
 0x1f6   :  { %v1821_v29 = vadd.f32 %v1820_v2, %v1819_v19 }
 0x1f7   :  { %v1271_v26 = vadd.f32 %v1818_v55, %v1193_v57  ;;  %v1196_v8 = vadd.f32 %v1933_v13, %v2826_v27 }
 0x1f9   :  { %1303 = vst [vmem:[#allocation5 + $0x80] sm:$0xff] %v1271_v26  ;;  %v1272_v34 = vadd.f32 %v1821_v29, %v1196_v8  ;;  %v1934_v36 = vpop.f32.mrb[68].mxu0 }
 0x1fa   :  { %v1822_v38 = vpop.f32.mrb[68].mxu1  ;;  %v1935_v40 = vpop.f32.mrb[69].mxu0 }
 0x1fb   :  { %1304 = vst [vmem:[#allocation5 + $0x88] sm:$0xff] %v1272_v34  ;;  %v1823_v48 = vpop.f32.mrb[69].mxu1  ;;  %v1936_v43 = vadd.f32 %v1935_v40, %v1934_v36  ;;  %v1937_v45 = vpop.f32.mrb[70].mxu0 }
 0x1fc   :  { %v1824_v47 = vadd.f32 %v1823_v48, %v1822_v38  ;;  %v1825_v50 = vpop.f32.mrb[70].mxu1  ;;  %v1938_v56 = vpop.f32.mrb[71].mxu0 }
 0x1fd   :  { %v1201_v4 = vadd.f32 %v1936_v43, %v2830_v39  ;;  %v1826_v35 = vpop.f32.mrb[71].mxu1  ;;  %v1939_v59 = vadd.f32 %v1938_v56, %v1937_v45 }
 0x1fe   :  { %v1827_v53 = vadd.f32 %v1826_v35, %v1825_v50 }
 0x1ff   :  { %v1273_v54 = vadd.f32 %v1824_v47, %v1201_v4  ;;  %v1204_v27 = vadd.f32 %v1939_v59, %v2834_v44 }
 0x201   :  { %1305 = vst [vmem:[#allocation5 + $0x90] sm:$0xff] %v1273_v54  ;;  %v1274_v62 = vadd.f32 %v1827_v53, %v1204_v27  ;;  %v1940_v12 = vpop.f32.mrb[72].mxu0 }
 0x202   :  { %v1828_v63 = vpop.f32.mrb[72].mxu1  ;;  %v1941_v18 = vpop.f32.mrb[73].mxu0 }
 0x203   :  { %1306 = vst [vmem:[#allocation5 + $0x98] sm:$0xff] %v1274_v62  ;;  %v1829_v5 = vpop.f32.mrb[73].mxu1  ;;  %v1942_v6 = vadd.f32 %v1941_v18, %v1940_v12  ;;  %v1943_v9 = vpop.f32.mrb[74].mxu0 }
 0x204   :  { %v1830_v15 = vadd.f32 %v1829_v5, %v1828_v63  ;;  %v1831_v3 = vpop.f32.mrb[74].mxu1  ;;  %v1944_v16 = vpop.f32.mrb[75].mxu0 }
 0x205   :  { %v1209_v39 = vadd.f32 %v1942_v6, %v2838_v51  ;;  %v1832_v17 = vpop.f32.mrb[75].mxu1  ;;  %v1945_v21 = vadd.f32 %v1944_v16, %v1943_v9 }
 0x206   :  { %v1833_v37 = vadd.f32 %v1832_v17, %v1831_v3 }
 0x207   :  { %v1275_v22 = vadd.f32 %v1830_v15, %v1209_v39  ;;  %v1212_v44 = vadd.f32 %v1945_v21, %v2842_v60 }
 0x209   :  { %1307 = vst [vmem:[#allocation5 + $0xa0] sm:$0xff] %v1275_v22  ;;  %v1276_v10 = vadd.f32 %v1833_v37, %v1212_v44  ;;  %v1946_v24 = vpop.f32.mrb[76].mxu0 }
 0x20a   :  { %v1834_v25 = vpop.f32.mrb[76].mxu1  ;;  %v1947_v46 = vpop.f32.mrb[77].mxu0 }
 0x20b   :  { %1308 = vst [vmem:[#allocation5 + $0xa8] sm:$0xff] %v1276_v10  ;;  %v1835_v1 = vpop.f32.mrb[77].mxu1  ;;  %v1948_v28 = vadd.f32 %v1947_v46, %v1946_v24  ;;  %v1949_v31 = vpop.f32.mrb[78].mxu0 }
 0x20c   :  { %v1836_v32 = vadd.f32 %v1835_v1, %v1834_v25  ;;  %v1837_v33 = vpop.f32.mrb[78].mxu1  ;;  %v1950_v42 = vpop.f32.mrb[79].mxu0 }
 0x20d   :  { %v1217_v51 = vadd.f32 %v1948_v28, %v2846_v7  ;;  %v1838_v52 = vpop.f32.mrb[79].mxu1  ;;  %v1951_v55 = vadd.f32 %v1950_v42, %v1949_v31 }
 0x20e   :  { %v1839_v19 = vadd.f32 %v1838_v52, %v1837_v33 }
 0x20f   :  { %v1277_v61 = vadd.f32 %v1836_v32, %v1217_v51  ;;  %v1220_v60 = vadd.f32 %v1951_v55, %v2850_v14 }
 0x211   :  { %1309 = vst [vmem:[#allocation5 + $0xb0] sm:$0xff] %v1277_v61  ;;  %v1278_v57 = vadd.f32 %v1839_v19, %v1220_v60  ;;  %v1952_v2 = vpop.f32.mrb[80].mxu0 }
 0x212   :  { %v1840_v13 = vpop.f32.mrb[80].mxu1  ;;  %v1953_v29 = vpop.f32.mrb[81].mxu0 }
 0x213   :  { %1310 = vst [vmem:[#allocation5 + $0xb8] sm:$0xff] %v1278_v57  ;;  %v1841_v26 = vpop.f32.mrb[81].mxu1  ;;  %v1954_v8 = vadd.f32 %v1953_v29, %v1952_v2  ;;  %v1955_v34 = vpop.f32.mrb[82].mxu0 }
 0x214   :  { %v1842_v36 = vadd.f32 %v1841_v26, %v1840_v13  ;;  %v1843_v38 = vpop.f32.mrb[82].mxu1  ;;  %v1956_v40 = vpop.f32.mrb[83].mxu0 }
 0x215   :  { %v1225_v7 = vadd.f32 %v1954_v8, %v2854_v23  ;;  %v1844_v48 = vpop.f32.mrb[83].mxu1  ;;  %v1957_v43 = vadd.f32 %v1956_v40, %v1955_v34 }
 0x216   :  { %v1845_v45 = vadd.f32 %v1844_v48, %v1843_v38 }
 0x217   :  { %v1279_v47 = vadd.f32 %v1842_v36, %v1225_v7  ;;  %v1228_v14 = vadd.f32 %v1957_v43, %v2858_v30 }
 0x219   :  { %1311 = vst [vmem:[#allocation5 + $0xc0] sm:$0xff] %v1279_v47  ;;  %v1280_v50 = vadd.f32 %v1845_v45, %v1228_v14  ;;  %v1958_v56 = vpop.f32.mrb[84].mxu0 }
 0x21a   :  { %v1846_v4 = vpop.f32.mrb[84].mxu1  ;;  %v1959_v35 = vpop.f32.mrb[85].mxu0 }
 0x21b   :  { %1312 = vst [vmem:[#allocation5 + $0xc8] sm:$0xff] %v1280_v50  ;;  %v1847_v59 = vpop.f32.mrb[85].mxu1  ;;  %v1960_v53 = vadd.f32 %v1959_v35, %v1958_v56  ;;  %v1961_v54 = vpop.f32.mrb[86].mxu0 }
 0x21c   :  { %v1848_v27 = vadd.f32 %v1847_v59, %v1846_v4  ;;  %v1849_v62 = vpop.f32.mrb[86].mxu1  ;;  %v1962_v12 = vpop.f32.mrb[87].mxu0 }
 0x21d   :  { %v1233_v23 = vadd.f32 %v1960_v53, %v2862_v58  ;;  %v1850_v63 = vpop.f32.mrb[87].mxu1  ;;  %v1963_v18 = vadd.f32 %v1962_v12, %v1961_v54 }
 0x21e   :  { %v1851_v5 = vadd.f32 %v1850_v63, %v1849_v62 }
 0x21f   :  { %v1281_v6 = vadd.f32 %v1848_v27, %v1233_v23  ;;  %v1236_v30 = vadd.f32 %v1963_v18, %v2866_v20 }
 0x221   :  { %1313 = vst [vmem:[#allocation5 + $0xd0] sm:$0xff] %v1281_v6  ;;  %v1282_v9 = vadd.f32 %v1851_v5, %v1236_v30  ;;  %v1964_v15 = vpop.f32.mrb[88].mxu0 }
 0x222   :  { %v1852_v3 = vpop.f32.mrb[88].mxu1  ;;  %v1965_v16 = vpop.f32.mrb[89].mxu0 }
 0x223   :  { %1314 = vst [vmem:[#allocation5 + $0xd8] sm:$0xff] %v1282_v9  ;;  %v1853_v39 = vpop.f32.mrb[89].mxu1  ;;  %v1966_v17 = vadd.f32 %v1965_v16, %v1964_v15  ;;  %v1967_v21 = vpop.f32.mrb[90].mxu0 }
 0x224   :  { %v1854_v37 = vadd.f32 %v1853_v39, %v1852_v3  ;;  %v1855_v22 = vpop.f32.mrb[90].mxu1  ;;  %v1968_v44 = vpop.f32.mrb[91].mxu0 }
 0x225   :  { %v1241_v58 = vadd.f32 %v1966_v17, %v2870_v41  ;;  %v1856_v10 = vpop.f32.mrb[91].mxu1  ;;  %v1969_v24 = vadd.f32 %v1968_v44, %v1967_v21 }
 0x226   :  { %v1857_v25 = vadd.f32 %v1856_v10, %v1855_v22 }
 0x227   :  { %v1283_v46 = vadd.f32 %v1854_v37, %v1241_v58  ;;  %v1244_v20 = vadd.f32 %v1969_v24, %v2874_v49 }
 0x229   :  { %1315 = vst [vmem:[#allocation5 + $0xe0] sm:$0xff] %v1283_v46  ;;  %v1284_v1 = vadd.f32 %v1857_v25, %v1244_v20  ;;  %v1970_v28 = vpop.f32.mrb[92].mxu0 }
 0x22a   :  { %v1858_v31 = vpop.f32.mrb[92].mxu1  ;;  %v1971_v32 = vpop.f32.mrb[93].mxu0 }
 0x22b   :  { %1316 = vst [vmem:[#allocation5 + $0xe8] sm:$0xff] %v1284_v1  ;;  %v1859_v33 = vpop.f32.mrb[93].mxu1  ;;  %v1972_v42 = vadd.f32 %v1971_v32, %v1970_v28  ;;  %v1973_v51 = vpop.f32.mrb[94].mxu0 }
 0x22c   :  { %v1860_v52 = vadd.f32 %v1859_v33, %v1858_v31  ;;  %v1861_v55 = vpop.f32.mrb[94].mxu1  ;;  %v1974_v19 = vpop.f32.mrb[95].mxu0 }
 0x22d   :  { %v1249_v41 = vadd.f32 %v1972_v42, %v2878_v0  ;;  %v1862_v61 = vpop.f32.mrb[95].mxu1  ;;  %v1975_v60 = vadd.f32 %v1974_v19, %v1973_v51 }
 0x22e   :  { %v1863_v57 = vadd.f32 %v1862_v61, %v1861_v55 }
 0x22f   :  { %v1285_v49 = vadd.f32 %v1860_v52, %v1249_v41  ;;  %v1252_v2 = vadd.f32 %v1975_v60, %v2882_v11 }
 0x231   :  { %1317 = vst [vmem:[#allocation5 + $0xf0] sm:$0xff] %v1285_v49  ;;  %v1286_v13 = vadd.f32 %v1863_v57, %v1252_v2 }
 0x233   :  { %1318 = vst [vmem:[#allocation5 + $0xf8] sm:$0xff] %v1286_v13 }
 0x234   :  { %2083 = shalt.err (!%p2080_p12)
}
 0x235   :  { %s2084_s22 = scalar_lea.hbm %s2932_s4, 4096 }
 0x236   :  { %p2085_p13 = scmp.ne.s32.totalorder %s2932_s4, %s2084_s22  ;;  %p2088_p0 = scmp.lt.u32.totalorder %s2084_s22, %s2932_s4 }
 0x238   :  { %p2090_p1 = pnand %p2088_p0, %p2085_p13 }
 0x23a   :  { %2093 = shalt.err (!%p2090_p1)
}
 0x23b   :  { %s2104_s27 = smov 128   ;;  %s2105_s28 = smov 8  }
 0x23c   :  { %1330 = dma.vmem_to_hbm [thread:$0]  %s1325_s18, 4096, %s2932_s4, [#allocation4], %s2104_s27, %s2104_s27, %s2105_s28  }
 0x23d   :  { %2096 = dma.done.wait [#allocation4], 4096  }
 0x23e   :  { %2097 = vsyncadd [#allocation4], 4294963200 }
 0x23f   :  { %1334 = vsyncpa [#allocation3], 1 }
 0x240   :  { %1335 = vsyncpa [#allocation4], 1 }

</bundles_post_ra>
